<compile_context>
chip_gen: v5e
topology: v5e:2x2
jax: 0.10.0
libtpu: 0.0.40
codegen_flags: <defaults>
</compile_context>

<pallas_src>
import functools

import jax
import jax.numpy as jnp
from jax import lax
from jax.experimental import pallas as pl
from jax.experimental.pallas import tpu as pltpu


# ---------------------------------------------------------------------------
# pltpu.roll rotation-direction probe (one tiny kernel, run once, cached).
# The im2col taps need shifted[s] = x[s + off]; probing the convention keeps
# that correct regardless of the installed jax/Mosaic version.
# ---------------------------------------------------------------------------
@functools.lru_cache(maxsize=None)
def _roll_matches_numpy() -> bool:
    def k(x_ref, o_ref):
        o_ref[...] = pltpu.roll(x_ref[...], 1, axis=1)

    x = jnp.arange(8 * 128, dtype=jnp.float32).reshape(8, 128)
    y = pl.pallas_call(
        k, out_shape=jax.ShapeDtypeStruct((8, 128), jnp.float32))(x)
    # np.roll(x, 1, axis=1)[0, 0] == x[0, 127] == 127.0
    return bool(jax.device_get(y)[0, 0] == 127.0)


# ---------------------------------------------------------------------------
# Kernel A: Conv3d(3x3x3, stride 1, pad 1) + InstanceNorm3d(affine=False)
#           + LeakyReLU(0.01) + global average pool.  One batch per grid step.
#           Layout: (C, S) with S = D*H*W on the lane axis (lane-dense).
# ---------------------------------------------------------------------------
def _conv_in_lrelu_kernel(x_ref, w_ref, y_ref, pool_ref, im_ref, *,
                          C, D, H, W, eps, slope, roll_like_np):
    S = D * H * W
    HW = H * W
    x = x_ref[0]                                     # (C, S) f32, lane-dense

    # Per-lane spatial coordinates of the flattened index.
    s_idx = lax.broadcasted_iota(jnp.int32, (C, S), 1)
    d_idx = s_idx // HW
    h_idx = (s_idx // W) % H
    w_idx = s_idx % W

    def axis_mask(idx, off, n):
        if off == 0:
            return None
        return (idx + off >= 0) & (idx + off < n)

    # Build the (27*C, S) im2col matrix in VMEM scratch: row block k holds the
    # input shifted by tap (kd, kh, kw), zeroed outside the padding=1 halo.
    k = 0
    for od in (-1, 0, 1):
        md = axis_mask(d_idx, od, D)
        for oh in (-1, 0, 1):
            mh = axis_mask(h_idx, oh, H)
            for ow in (-1, 0, 1):
                mw = axis_mask(w_idx, ow, W)
                off = od * HW + oh * W + ow
                if off == 0:
                    shifted = x
                else:
                    shift = (-off) % S if roll_like_np else off % S
                    shifted = pltpu.roll(x, shift, axis=1)
                mask = None
                for m in (md, mh, mw):
                    if m is not None:
                        mask = m if mask is None else (mask & m)
                if mask is not None:
                    shifted = jnp.where(mask, shifted, 0.0)
                im_ref[k * C:(k + 1) * C, :] = shifted
                k += 1

    # The whole 3x3x3 conv as one MXU matmul: (C, 27C) @ (27C, S) -> (C, S).
    # (conv bias omitted: InstanceNorm's mean subtraction cancels it exactly.)
    y = jnp.dot(w_ref[...], im_ref[...], preferred_element_type=jnp.float32)

    # InstanceNorm3d (affine=False, biased variance) via lane reductions.
    mean = jnp.mean(y, axis=1, keepdims=True)                  # (C, 1)
    var = jnp.mean((y - mean) ** 2, axis=1, keepdims=True)     # (C, 1)
    y = (y - mean) * lax.rsqrt(var + eps)

    # LeakyReLU(0.01)
    y = jnp.where(y >= 0, y, slope * y)

    y_ref[...] = y.reshape(1, C, S)
    pool_ref[...] = jnp.mean(y, axis=1, keepdims=True).reshape(1, C, 1)


def conv_in_lrelu(x_flat, w2, *, D, H, W, eps=1e-5, slope=0.01):
    B, C, S = x_flat.shape
    kern = functools.partial(
        _conv_in_lrelu_kernel, C=C, D=D, H=H, W=W, eps=eps, slope=slope,
        roll_like_np=_roll_matches_numpy())
    y, pooled = pl.pallas_call(
        kern,
        out_shape=(jax.ShapeDtypeStruct((B, C, S), jnp.float32),
                   jax.ShapeDtypeStruct((B, C, 1), jnp.float32)),
        grid_spec=pltpu.PrefetchScalarGridSpec(
            num_scalar_prefetch=0,
            grid=(B,),
            in_specs=[
                pl.BlockSpec((1, C, S), lambda b: (b, 0, 0)),
                pl.BlockSpec((C, 27 * C), lambda b: (0, 0)),
            ],
            out_specs=[
                pl.BlockSpec((1, C, S), lambda b: (b, 0, 0)),
                pl.BlockSpec((1, C, 1), lambda b: (b, 0, 0)),
            ],
            scratch_shapes=[pltpu.VMEM((27 * C, S), jnp.float32)],
        ),
        compiler_params=pltpu.CompilerParams(
            dimension_semantics=("parallel",)),
    )(x_flat, w2)
    return y, pooled[:, :, 0]


# ---------------------------------------------------------------------------
# Kernel B: out[b] = y[b] + P[b] @ y[b]   (channel exchange + residual add).
#           One lane-dense (C, S) block per batch; the gather is an exact
#           one-hot-permutation matmul, so y is read from HBM only once.
# ---------------------------------------------------------------------------
def _exchange_add_kernel(perm_ref, y_ref, out_ref):
    C, S = y_ref.shape[1], y_ref.shape[2]
    y = y_ref[0]                                               # (C, S)
    gathered = jnp.dot(perm_ref[0], y, preferred_element_type=jnp.float32)
    out_ref[...] = (y + gathered).reshape(1, C, S)


def exchange_add(y, perm):
    B, C, S = y.shape
    return pl.pallas_call(
        _exchange_add_kernel,
        out_shape=jax.ShapeDtypeStruct((B, C, S), jnp.float32),
        grid_spec=pltpu.PrefetchScalarGridSpec(
            num_scalar_prefetch=0,
            grid=(B,),
            in_specs=[
                pl.BlockSpec((1, C, C), lambda b: (b, 0, 0)),
                pl.BlockSpec((1, C, S), lambda b: (b, 0, 0)),
            ],
            out_specs=pl.BlockSpec((1, C, S), lambda b: (b, 0, 0)),
        ),
        compiler_params=pltpu.CompilerParams(
            dimension_semantics=("parallel",)),
    )(perm, y)


# ---------------------------------------------------------------------------
# Full CSA forward (glue in plain JAX, hot paths in the kernels above).
# ---------------------------------------------------------------------------
def csa_forward(x, params):
    # x: (B, C, D, H, W) float32 (NCDHW), matching the PyTorch module.
    B, C, D, H, W = x.shape
    S = D * H * W
    x_flat = x.reshape(B, C, S)                               # free reshape
    # torch conv weight (Cout, Cin, kd, kh, kw) -> (Cout, 27*Cin), tap-major.
    w2 = jnp.transpose(params["conv_w"], (0, 2, 3, 4, 1)).reshape(C, 27 * C)

    y, pooled = conv_in_lrelu(x_flat, w2, D=D, H=H, W=W)      # (B,C,S), (B,C)

    # Tiny channel-attention MLP + argsort (plain JAX glue; O(B*C) work).
    h = pooled @ params["fc1_w"].T + params["fc1_b"]
    h = jnp.where(h >= 0, h, 0.01 * h)
    s = jax.nn.sigmoid(h @ params["fc2_w"].T + params["fc2_b"])
    order = jnp.argsort(s, axis=-1)                           # (B, C) ascending
    perm = jax.nn.one_hot(order, C, dtype=jnp.float32)        # (B, C, C)

    out = exchange_add(y, perm)                               # (B, C, S)
    return out.reshape(B, C, D, H, W)


# ---------------------------------------------------------------------------
# Pure-JAX reference for validation (includes the conv bias, which the kernel
# omits because InstanceNorm cancels it — results must match exactly).
# ---------------------------------------------------------------------------
def csa_reference(x, params):
    B, C, D, H, W = x.shape
    y = lax.conv_general_dilated(
        x, params["conv_w"], window_strides=(1, 1, 1),
        padding=[(1, 1), (1, 1), (1, 1)],
        dimension_numbers=("NCDHW", "OIDHW", "NCDHW"))
    y = y + params["conv_b"][None, :, None, None, None]
    mean = jnp.mean(y, axis=(2, 3, 4), keepdims=True)
    var = jnp.mean((y - mean) ** 2, axis=(2, 3, 4), keepdims=True)
    y = (y - mean) * lax.rsqrt(var + 1e-5)
    y = jnp.where(y >= 0, y, 0.01 * y)
    pooled = jnp.mean(y, axis=(2, 3, 4))
    h = pooled @ params["fc1_w"].T + params["fc1_b"]
    h = jnp.where(h >= 0, h, 0.01 * h)
    s = jax.nn.sigmoid(h @ params["fc2_w"].T + params["fc2_b"])
    order = jnp.argsort(s, axis=-1)
    gathered = y[jnp.arange(B)[:, None], order]
    return y + gathered


if __name__ == "__main__":
    B, C, D, H, W = 2, 16, 8, 8, 8          # inc=16, ratio=0.25 -> hidden=4
    hidden = int(C * 0.25)

    key = jax.random.PRNGKey(0)
    k = jax.random.split(key, 6)
    params = {
        "conv_w": jax.random.normal(k[0], (C, C, 3, 3, 3), jnp.float32) * 0.1,
        "conv_b": jax.random.normal(k[1], (C,), jnp.float32) * 0.1,
        "fc1_w": jax.random.normal(k[2], (hidden, C), jnp.float32) * 0.3,
        "fc1_b": jax.random.normal(k[3], (hidden,), jnp.float32) * 0.1,
        "fc2_w": jax.random.normal(k[4], (C, hidden), jnp.float32) * 0.3,
        "fc2_b": jax.random.normal(k[5], (C,), jnp.float32) * 0.1,
    }
    x = jax.random.normal(jax.random.PRNGKey(42), (B, C, D, H, W), jnp.float32)

    out = jax.block_until_ready(csa_forward(x, params))
    ref = jax.block_until_ready(csa_reference(x, params))

    assert out.shape == (B, C, D, H, W)
    assert jnp.allclose(out, ref, rtol=1e-3, atol=1e-3), \
        f"max err {jnp.max(jnp.abs(out - ref))}"
    print("KERNEL_OK")
</pallas_src>

<mosaic_0001>
module attributes {stable_mosaic.version = 11 : i64} {
  func.func @k(%arg0: memref<8x128xf32, #tpu.memory_space<vmem>>, %arg1: memref<8x128xf32, #tpu.memory_space<vmem>>) attributes {dimension_semantics = [], scalar_prefetch = 0 : i64, scratch_operands = 0 : i64, tpu.core_type = #tpu.core_type<tc>} {
    %c0 = arith.constant 0 : index
    %c0_0 = arith.constant 0 : index
    %0 = vector.load %arg0[%c0, %c0_0] : memref<8x128xf32, #tpu.memory_space<vmem>>, vector<8x128xf32>
    %c1_i32 = arith.constant 1 : i32
    %1 = tpu.dynamic_rotate %0 by %c1_i32 dim 1 : vector<8x128xf32>, i32 -> vector<8x128xf32>
    %c0_1 = arith.constant 0 : index
    %c0_2 = arith.constant 0 : index
    %2 = vector.load %arg1[%c0_1, %c0_2] : memref<8x128xf32, #tpu.memory_space<vmem>>, vector<8x128xf32>
    tpu.vector_store %arg1[%c0_1, %c0_2], %1 {strides = array<i32>} : memref<8x128xf32, #tpu.memory_space<vmem>>, vector<8x128xf32>,
    return
  }
}

</mosaic_0001>

<bundles_post_ra>
// kernel: tpu_custom_call.1
= control target key start
LH: loop header
LB: loop body
LE: loop exit
PB: predicated region body
PF: predicated region fallthrough
CT: control target
= control target key end

     0   :  { %6 = vsyncpa [#allocation3], 0  ;;  %s118_s0 = inlined_call_operand.hbm [shape: f32[8,128], index: 0, kind: input, shape index: {}]   ;;  %s119_s1 = inlined_call_operand.hbm [shape: f32[8,128], index: 1, kind: output, shape index: {}]  }
   0x1   :  { %7 = vsyncpa [#allocation4], 0  ;;  %s13_s8 = sshll.u32 %s118_s0, 4  ;;  %s99_s9 = smov [#allocation2]   ;;  %s14_s8 = int_to_ptr.hbm [resolvable:$true] %s13_s8 }
   0x2   :  { %s15_s10 = sshll.u32 %s99_s9, 4  ;;  %s16_s10 = int_to_ptr.vmem [resolvable:$true] %s15_s10 }
   0x3   :  { %18 = dma.hbm_to_vmem [thread:$0]  %s14_s8, 128, %s16_s10, [#allocation3]  }
   0x4   :  { %95 = dma.done.wait [#allocation3], 128  }
   0x5   :  { %96 = vsyncadd [#allocation3], 4294967168  ;;  %v23_v0 = vld [vmem:[#allocation2] sm:$0xff]  ;;  %s100_s11 = smov 1   ;;  %s101_s12 = smov [#allocation5]  }
   0x6   :  { %24 = vrot.lane.b32.xlu0 %v23_v0, %s100_s11  ;;  %s32_s13 = sshll.u32 %s101_s12, 4  ;;  %s34_s16 = sshll.u32 %s119_s1, 4  ;;  %s33_s13 = int_to_ptr.vmem [resolvable:$true] %s32_s13  ;;  %s35_s16 = int_to_ptr.hbm [resolvable:$true] %s34_s16 }
  0x78   :  { %v25_v1 = vpop.permute.xlu0 %24 }
  0x79   :  { %26 = vst [vmem:[#allocation5] sm:$0xff] %v25_v1 }
  0x7a   :  { %37 = dma.vmem_to_hbm [thread:$0]  %s33_s13, 128, %s35_s16, [#allocation4]  }
  0x7b   :  { %97 = dma.done.wait [#allocation4], 128  }
  0x7c   :  { %98 = vsyncadd [#allocation4], 4294967168 }
  0x7d   :  { %42 = vsyncpa [#allocation3], 1 }
  0x7e   :  { %43 = vsyncpa [#allocation4], 1 }

</bundles_post_ra>
